<compile_context>
chip_gen: v7x
topology: tpu7x:2x2x1
jax: 0.10.0
libtpu: 0.0.40
codegen_flags: <defaults>
</compile_context>

<pallas_src>
import math
import jax
import jax.numpy as jnp
from jax.experimental import pallas as pl
from jax.experimental.pallas import tpu as pltpu


def _round_up(x, m):
    return (x + m - 1) // m * m


def _vmem_limit_bytes(tm, tv, d, in_bytes, out_bytes):
    """Size the scoped VMEM limit from the tile footprint (clamped to 64 MiB)."""
    est = (2 * tm * d * in_bytes        # x tiles (double-buffered)
           + 2 * d * tv * in_bytes      # weight tiles (double-buffered)
           + 2 * tv * 4                 # bias tiles
           + 2 * tm * tv * out_bytes    # output tiles
           + 2 * tm * 4                 # lse tiles / m,l scratch
           + 4 * tm * tv * 4            # f32 logits / exp temporaries
           + (2 << 20))                 # headroom
    return int(min(max(est, 32 * 1024 * 1024), 64 * 1024 * 1024))


# ---------------------------------------------------------------------------
# Path 1: whole (padded) vocab fits in a single lane-dense tile -> fused kernel.
# ---------------------------------------------------------------------------
def _proj_logsoftmax_fused_kernel(x_ref, w_ref, b_ref, o_ref):
    # bf16 operands on the MXU, f32 accumulation; softmax math in f32.
    logits = jnp.dot(x_ref[...], w_ref[...],
                     preferred_element_type=jnp.float32)
    logits = logits + b_ref[...].astype(jnp.float32)
    m = jnp.max(logits, axis=-1, keepdims=True)
    shifted = logits - m
    lse = jnp.log(jnp.sum(jnp.exp(shifted), axis=-1, keepdims=True))
    o_ref[...] = (shifted - lse).astype(o_ref.dtype)


# ---------------------------------------------------------------------------
# Path 2a: online logsumexp over vocab tiles (running max / sum-exp in VMEM).
# Grid: (row_tiles, vocab_tiles); vocab is the carried (reduction) axis.
# ---------------------------------------------------------------------------
def _lse_kernel(x_ref, w_ref, b_ref, lse_ref, m_sc, l_sc):
    j = pl.program_id(1)

    @pl.when(j == 0)
    def _():
        m_sc[...] = jnp.full_like(m_sc, -jnp.inf)
        l_sc[...] = jnp.zeros_like(l_sc)

    logits = jnp.dot(x_ref[...], w_ref[...],
                     preferred_element_type=jnp.float32)
    logits = logits + b_ref[...].astype(jnp.float32)

    m_prev = m_sc[...]
    m_new = jnp.maximum(m_prev, jnp.max(logits, axis=-1, keepdims=True))
    l_sc[...] = (l_sc[...] * jnp.exp(m_prev - m_new)
                 + jnp.sum(jnp.exp(logits - m_new), axis=-1, keepdims=True))
    m_sc[...] = m_new

    @pl.when(j == pl.num_programs(1) - 1)
    def _():
        lse_ref[...] = m_sc[...] + jnp.log(l_sc[...])


# ---------------------------------------------------------------------------
# Path 2b: recompute the logits tile and finalize: out = logits - lse.
# Grid: (row_tiles, vocab_tiles); every (i, j) is independent.
# ---------------------------------------------------------------------------
def _finalize_kernel(x_ref, w_ref, b_ref, lse_ref, o_ref):
    logits = jnp.dot(x_ref[...], w_ref[...],
                     preferred_element_type=jnp.float32)
    logits = logits + b_ref[...].astype(jnp.float32)
    o_ref[...] = (logits - lse_ref[...]).astype(o_ref.dtype)


def projection_layer(x, weight, bias, *, tm=256, tv=2048,
                     compute_dtype=jnp.bfloat16, out_dtype=None):
    """log_softmax(x @ weight + bias, axis=-1).

    x:      (B, S, D) float
    weight: (D, V)    (transposed vs. torch nn.Linear's (V, D) storage)
    bias:   (V,)
    returns (B, S, V) log-probabilities in `out_dtype` (default: x.dtype).
    """
    B, S, D = x.shape
    V = weight.shape[1]
    out_dtype = x.dtype if out_dtype is None else out_dtype

    M = B * S
    # Sublane-aligned row tile, lane-dense vocab tile (multiple of 128).
    tm = min(tm, _round_up(M, 8))
    tv = min(tv, _round_up(V, 128))
    Mp = _round_up(M, tm)
    Vp = _round_up(V, tv)

    in_bytes = jnp.dtype(compute_dtype).itemsize
    out_bytes = jnp.dtype(out_dtype).itemsize
    vmem_limit = _vmem_limit_bytes(tm, tv, D, in_bytes, out_bytes)

    # Cast matmul operands once in the wrapper; bias stays f32.
    x2 = x.reshape(M, D).astype(compute_dtype)
    w2 = weight.astype(compute_dtype)
    b2 = bias.astype(jnp.float32).reshape(1, V)

    if Mp != M:
        x2 = jnp.pad(x2, ((0, Mp - M), (0, 0)))
    if Vp != V:
        # Padded vocab columns: zero weight + very negative bias -> exp() == 0,
        # so they do not perturb the softmax normalization of real columns.
        w2 = jnp.pad(w2, ((0, 0), (0, Vp - V)))
        b2 = jnp.pad(b2, ((0, 0), (0, Vp - V)), constant_values=-1e9)

    n_row = Mp // tm
    n_voc = Vp // tv

    if n_voc == 1:
        # Whole vocab in one tile: fully fused matmul + log-softmax.
        # Weight/bias index maps are constant -> fetched once, kept resident.
        out2 = pl.pallas_call(
            _proj_logsoftmax_fused_kernel,
            out_shape=jax.ShapeDtypeStruct((Mp, Vp), out_dtype),
            grid_spec=pltpu.PrefetchScalarGridSpec(
                num_scalar_prefetch=0,
                grid=(n_row,),
                in_specs=[
                    pl.BlockSpec((tm, D), lambda i: (i, 0)),    # rows of x
                    pl.BlockSpec((D, tv), lambda i: (0, 0)),    # resident weight
                    pl.BlockSpec((1, tv), lambda i: (0, 0)),    # resident bias
                ],
                out_specs=pl.BlockSpec((tm, tv), lambda i: (i, 0)),
            ),
            compiler_params=pltpu.CompilerParams(
                dimension_semantics=("parallel",),
                vmem_limit_bytes=vmem_limit),
        )(x2, w2, b2)
    else:
        # Pass A: per-row logsumexp, streaming vocab tiles (online reduction).
        lse = pl.pallas_call(
            _lse_kernel,
            out_shape=jax.ShapeDtypeStruct((Mp, 1), jnp.float32),
            grid_spec=pltpu.PrefetchScalarGridSpec(
                num_scalar_prefetch=0,
                grid=(n_row, n_voc),
                in_specs=[
                    pl.BlockSpec((tm, D), lambda i, j: (i, 0)),
                    pl.BlockSpec((D, tv), lambda i, j: (0, j)),
                    pl.BlockSpec((1, tv), lambda i, j: (0, j)),
                ],
                out_specs=pl.BlockSpec((tm, 1), lambda i, j: (i, 0)),
                scratch_shapes=[pltpu.VMEM((tm, 1), jnp.float32),   # running max
                                pltpu.VMEM((tm, 1), jnp.float32)],  # running sum-exp
            ),
            compiler_params=pltpu.CompilerParams(
                dimension_semantics=("parallel", "arbitrary"),
                vmem_limit_bytes=vmem_limit),
        )(x2, w2, b2)

        # Pass B: recompute each logits tile and write logits - lse.
        out2 = pl.pallas_call(
            _finalize_kernel,
            out_shape=jax.ShapeDtypeStruct((Mp, Vp), out_dtype),
            grid_spec=pltpu.PrefetchScalarGridSpec(
                num_scalar_prefetch=0,
                grid=(n_row, n_voc),
                in_specs=[
                    pl.BlockSpec((tm, D), lambda i, j: (i, 0)),
                    pl.BlockSpec((D, tv), lambda i, j: (0, j)),
                    pl.BlockSpec((1, tv), lambda i, j: (0, j)),
                    pl.BlockSpec((tm, 1), lambda i, j: (i, 0)),
                ],
                out_specs=pl.BlockSpec((tm, tv), lambda i, j: (i, j)),
            ),
            compiler_params=pltpu.CompilerParams(
                dimension_semantics=("parallel", "parallel"),
                vmem_limit_bytes=vmem_limit),
        )(x2, w2, b2, lse)

    return out2[:M, :V].reshape(B, S, V)


def init_params(key, d_model, vocab_size):
    # Match nn.Linear default init: U(-1/sqrt(fan_in), 1/sqrt(fan_in)).
    kw, kb = jax.random.split(key)
    bound = 1.0 / math.sqrt(d_model)
    weight = jax.random.uniform(kw, (d_model, vocab_size), jnp.float32,
                                minval=-bound, maxval=bound)
    bias = jax.random.uniform(kb, (vocab_size,), jnp.float32,
                              minval=-bound, maxval=bound)
    return weight, bias


def _check(out, x, w, b, shape):
    M = shape[0] * shape[1]
    D = x.shape[-1]
    assert out.shape == shape
    # Loose check vs. exact f32 reference (kernel uses bf16 matmul operands).
    ref = jax.nn.log_softmax(x.reshape(M, D) @ w + b, axis=-1).reshape(shape)
    assert jnp.allclose(out, ref, atol=7e-2, rtol=7e-2), \
        float(jnp.max(jnp.abs(out - ref)))
    # Tight check vs. a reference with bf16-quantized operands (matches kernel
    # numerics: exact bf16 products, f32 accumulation, f32 softmax).
    xq = x.astype(jnp.bfloat16).astype(jnp.float32)
    wq = w.astype(jnp.bfloat16).astype(jnp.float32)
    refq = jax.nn.log_softmax(xq.reshape(M, D) @ wq + b, axis=-1).reshape(shape)
    assert jnp.allclose(out, refq, atol=2e-3, rtol=2e-3), \
        float(jnp.max(jnp.abs(out - refq)))


if __name__ == "__main__":
    key = jax.random.PRNGKey(0)
    k1x, k1p, k2x, k2p = jax.random.split(key, 4)

    # Case 1: small vocab -> single fused kernel (vocab in one lane-dense tile).
    B, S, D, V = 2, 8, 32, 128
    x1 = jax.random.normal(k1x, (B, S, D), jnp.float32)
    w1, b1 = init_params(k1p, D, V)
    out1 = projection_layer(x1, w1, b1)
    jax.block_until_ready(out1)
    _check(out1, x1, w1, b1, (B, S, V))

    # Case 2: forces the vocab-tiled two-pass path (online logsumexp + finalize),
    # with row padding (M=14 -> 16) and vocab padding (V=320 -> 384, tv=128).
    S2, V2 = 7, 320
    x2 = jax.random.normal(k2x, (B, S2, D), jnp.float32)
    w2, b2 = init_params(k2p, D, V2)
    out2 = projection_layer(x2, w2, b2, tm=8, tv=128)
    jax.block_until_ready(out2)
    _check(out2, x2, w2, b2, (B, S2, V2))

    print("KERNEL_OK")
</pallas_src>

<mosaic_0001>
module attributes {stable_mosaic.version = 11 : i64} {
  func.func @_proj_logsoftmax_fused_kernel(%arg0: i32, %arg1: memref<16x32xbf16, #tpu.memory_space<vmem>>, %arg2: memref<32x128xbf16, #tpu.memory_space<vmem>>, %arg3: memref<1x128xf32, #tpu.memory_space<vmem>>, %arg4: memref<16x128xf32, #tpu.memory_space<vmem>>) attributes {dimension_semantics = [#tpu.dimension_semantics<parallel>], iteration_bounds = array<i64: 1>, scalar_prefetch = 0 : i64, scratch_operands = 0 : i64, tpu.core_type = #tpu.core_type<tc>, window_params = [{transform_indices = @transform_0, window_bounds = array<i64: 16, 32>}, {pipeline_mode = #tpu.pipeline_mode<synchronous>, transform_indices = @transform_1, window_bounds = array<i64: 32, 128>}, {pipeline_mode = #tpu.pipeline_mode<synchronous>, transform_indices = @transform_2, window_bounds = array<i64: 1, 128>}, {transform_indices = @transform_3, window_bounds = array<i64: 16, 128>}]} {
    %c0 = arith.constant 0 : index
    %c0_0 = arith.constant 0 : index
    %0 = vector.load %arg1[%c0, %c0_0] : memref<16x32xbf16, #tpu.memory_space<vmem>>, vector<16x32xbf16>
    %c0_1 = arith.constant 0 : index
    %c0_2 = arith.constant 0 : index
    %1 = vector.load %arg2[%c0_1, %c0_2] : memref<32x128xbf16, #tpu.memory_space<vmem>>, vector<32x128xbf16>
    %cst = arith.constant dense<0.000000e+00> : vector<16x128xf32>
    %2 = tpu.matmul %0, %1, %cst {dimension_numbers = #tpu.dot_dimension_numbers<[1], [0], [0], [1], [0, 0, 1, 1], [], []>} : vector<16x32xbf16>, vector<32x128xbf16>, vector<16x128xf32> -> vector<16x128xf32>
    %c0_3 = arith.constant 0 : index
    %c0_4 = arith.constant 0 : index
    %3 = vector.load %arg3[%c0_3, %c0_4] : memref<1x128xf32, #tpu.memory_space<vmem>>, vector<1x128xf32>
    %4 = vector.broadcast %3 : vector<1x128xf32> to vector<16x128xf32>
    %5 = arith.addf %2, %4 : vector<16x128xf32>
    %cst_5 = arith.constant dense<0xFF800000> : vector<16xf32>
    %6 = vector.multi_reduction <maximumf>, %5, %cst_5 [1] : vector<16x128xf32> to vector<16xf32>
    %7 = vector.shape_cast %6 : vector<16xf32> to vector<16x1xf32>
    %8 = vector.broadcast %7 : vector<16x1xf32> to vector<16x128xf32>
    %9 = arith.subf %5, %8 : vector<16x128xf32>
    %10 = math.exp %9 : vector<16x128xf32>
    %cst_6 = arith.constant dense<0.000000e+00> : vector<16xf32>
    %11 = vector.multi_reduction <add>, %10, %cst_6 [1] : vector<16x128xf32> to vector<16xf32>
    %12 = vector.shape_cast %11 : vector<16xf32> to vector<16x1xf32>
    %13 = math.log %12 : vector<16x1xf32>
    %14 = vector.broadcast %13 : vector<16x1xf32> to vector<16x128xf32>
    %15 = arith.subf %9, %14 : vector<16x128xf32>
    %c0_7 = arith.constant 0 : index
    %c0_8 = arith.constant 0 : index
    %16 = vector.load %arg4[%c0_7, %c0_8] : memref<16x128xf32, #tpu.memory_space<vmem>>, vector<16x128xf32>
    tpu.vector_store %arg4[%c0_7, %c0_8], %15 {strides = array<i32>} : memref<16x128xf32, #tpu.memory_space<vmem>>, vector<16x128xf32>,
    return
  }
  func.func @transform_0(%arg0: i32) -> (i32, i32) {
    %c0_i32 = arith.constant 0 : i32
    %c0_i32_0 = arith.constant 0 : i32
    return %arg0, %c0_i32 : i32, i32
  }
  func.func @transform_1(%arg0: i32) -> (i32, i32) {
    %c0_i32 = arith.constant 0 : i32
    %c0_i32_0 = arith.constant 0 : i32
    %c0_i32_1 = arith.constant 0 : i32
    return %c0_i32, %c0_i32_0 : i32, i32
  }
  func.func @transform_2(%arg0: i32) -> (i32, i32) {
    %c0_i32 = arith.constant 0 : i32
    %c0_i32_0 = arith.constant 0 : i32
    %c0_i32_1 = arith.constant 0 : i32
    return %c0_i32, %c0_i32_0 : i32, i32
  }
  func.func @transform_3(%arg0: i32) -> (i32, i32) {
    %c0_i32 = arith.constant 0 : i32
    %c0_i32_0 = arith.constant 0 : i32
    return %arg0, %c0_i32 : i32, i32
  }
}

</mosaic_0001>

<bundles_post_ra>
// kernel: tpu_custom_call.1
= control target key start
LH: loop header
LB: loop body
LE: loop exit
PB: predicated region body
PF: predicated region fallthrough
CT: control target
= control target key end

     0   :  { %8 = vsyncpa [#allocation3], 0  ;;  %s335_s0 = inlined_call_operand.hbm [shape: bf16[16,32], index: 0, kind: input, shape index: {}]   ;;  %s336_s1 = inlined_call_operand.hbm [shape: bf16[32,128], index: 1, kind: input, shape index: {}]   ;;  %s337_s2 = inlined_call_operand.vmem [shape: f32[1,128], index: 2, kind: input, shape index: {}]   ;;  %s338_s3 = inlined_call_operand.hbm [shape: f32[16,128], index: 3, kind: output, shape index: {}]  }
   0x1   :  { %9 = vsyncpa [#allocation6], 0 }
   0x2   :  { %10 = vsyncpa [#allocation4], 0  ;;  %s267_s12 = smov [#allocation2]   ;;  %s195_s16 = scalar_lea.hbm %s335_s0, 128 }
   0x3   :  { %s16_s13 = sshll.u32 %s267_s12, 4  ;;  %p196_p0 = scmp.ne.s32.totalorder %s335_s0, %s195_s16  ;;  %s17_s13 = int_to_ptr.vmem [resolvable:$true] %s16_s13 }
   0x4   :  { %p199_p1 = scmp.lt.u32.totalorder %s195_s16, %s335_s0 }
   0x6   :  { %p201_p2 = pnand %p199_p1, %p196_p0 }
   0x8   :  { %204 = shalt.err (!%p201_p2)
}
   0x9   :  { %s205_s21 = scalar_lea.vmem %s17_s13, 128  ;;  %p210_p4 = scmp.lt.s32.totalorder %s17_s13, %s17_s13 }
   0xa   :  { %p206_p3 = scmp.ne.s32.totalorder %s17_s13, %s205_s21  ;;  %p211_p5 = scmp.lt.s32.totalorder %s205_s21, %s205_s21 }
   0xc   :  { %p212_p6 = por %p211_p5, %p210_p4 }
   0xe   :  { %p213_p7 = pnand %p212_p6, %p206_p3 }
  0x10   :  { %216 = shalt.err (!%p213_p7)
}
  0x11   :  { %s268_s22 = smov 64   ;;  %s269_s23 = smov 4  }
  0x12   :  { %22 = dma.hbm_to_vmem [thread:$0]  %s335_s0, 128, %s17_s13, [#allocation3], %s268_s22, %s268_s22, %s269_s23  }
  0x13   :  { %s270_s26 = smov [#allocation5]   ;;  %s217_s30 = scalar_lea.hbm %s336_s1, 256 }
  0x14   :  { %s28_s27 = sshll.u32 %s270_s26, 4  ;;  %p218_p8 = scmp.ne.s32.totalorder %s336_s1, %s217_s30  ;;  %s29_s27 = int_to_ptr.vmem [resolvable:$true] %s28_s27 }
  0x15   :  { %p221_p9 = scmp.lt.u32.totalorder %s217_s30, %s336_s1 }
  0x17   :  { %p223_p10 = pnand %p221_p9, %p218_p8 }
  0x19   :  { %226 = shalt.err (!%p223_p10)
}
  0x1a   :  { %s227_s8 = scalar_lea.vmem %s29_s27, 256  ;;  %p232_p12 = scmp.lt.s32.totalorder %s29_s27, %s29_s27 }
  0x1b   :  { %p228_p11 = scmp.ne.s32.totalorder %s29_s27, %s227_s8  ;;  %p233_p13 = scmp.lt.s32.totalorder %s227_s8, %s227_s8 }
  0x1d   :  { %p234_p0 = por %p233_p13, %p232_p12 }
  0x1f   :  { %p235_p1 = pnand %p234_p0, %p228_p11 }
  0x21   :  { %238 = shalt.err (!%p235_p1)
}
  0x22   :  { %34 = dma.hbm_to_vmem [thread:$0]  %s336_s1, 256, %s29_s27, [#allocation6], %s268_s22, %s268_s22, %s269_s23  }
  0x23   :  { %261 = dma.done.wait [#allocation3], 128  }
  0x24   :  { %262 = vsyncadd [#allocation3], 4294967168 }
  0x25   :  { %263 = dma.done.wait [#allocation6], 256  }
  0x26   :  { %264 = vsyncadd [#allocation6], 4294967040  ;;  %v271_v0 = vmov 0.0   ;;  %vm272_vm0 = vmmov 0   ;;  %v184_v1 = vld [vmem:[#allocation5] sm:$0xff]   ;;  %v185_v2 = vld [vmem:[#allocation5 + $0x8] sm:$0xff]  }
  0x27   :  { %167 = vmatprep.subr.bf16.mxu0 %v271_v0  ;;  %171 = vmatprep.mubr.msk.bf16.mxu0 %vm272_vm0, %v271_v0  ;;  %v186_v3 = vld [vmem:[#allocation2] sm:$0xff]   ;;  %vm74_vm1 = vcmask 261120   ;;  %s273_s1 = smov [#allocation7]  }
  0x28   :  { %168 = vmatpush3.bf16.msra.mxu0 %v184_v1  ;;  %v159_v4 = vld [vmem:[%s337_s2] ss:$0 sm:$0xff]  ;;  %s146_s2 = sshll.u32 %s273_s1, 4  ;;  %s147_s2 = int_to_ptr.vmem [resolvable:$true] %s146_s2 }
  0x29   :  { %169 = vmatprep.subr.bf16.mxu0 %v271_v0  ;;  %s239_s12 = scalar_lea.vmem %s147_s2, 256  ;;  %p244_p3 = scmp.lt.s32.totalorder %s147_s2, %s147_s2 }
  0x2a   :  { %p240_p2 = scmp.ne.s32.totalorder %s147_s2, %s239_s12  ;;  %p245_p4 = scmp.lt.s32.totalorder %s239_s12, %s239_s12 }
  0x2c   :  { %170 = vmatpush3.bf16.msra.mxu0 %v185_v2  ;;  %p246_p5 = por %p245_p4, %p244_p3 }
  0x2e   :  { %p247_p6 = pnand %p246_p5, %p240_p2 }
  0x2f   :  { %172 = vmatmul.mubr.msk.bf16.vlgmr.msra.gmra.mrb[0].mxu0 %vm74_vm1, %v186_v3 }
 0x102   :  { %v112_v5 = vpop.f32.mrb[0].mxu0 }
 0x103   :  { %v113_v6 = vadd.f32 %v159_v4, %v112_v5  ;;  %v173_v7 = vpop.f32.mrb[1].mxu0 }
 0x104   :  { %v115_v8 = vpop.f32.mrb[2].mxu0 }
 0x105   :  { %119 = vmax.xlane.f32.xlu0 %v113_v6  ;;  %v174_v9 = vpop.f32.mrb[3].mxu0  ;;  %v116_v10 = vadd.f32 %v159_v4, %v115_v8 }
 0x109   :  { %121 = vmax.xlane.f32.xlu0 %v116_v10 }
 0x192   :  { %v120_v11 = vpop.xlane.xlu0 %119 }
 0x193   :  { %v123_v12 = vsub.f32 %v113_v6, %v120_v11 }
 0x195   :  { %v125_v13 = vmul.f32 1.442695, %v123_v12 }
 0x196   :  { %v122_v14 = vpop.xlane.xlu0 %121 }
 0x197   :  { %v124_v15 = vsub.f32 %v116_v10, %v122_v14  ;;  %187 = vpow2.f32 %v125_v13 }
 0x199   :  { %v127_v16 = vmul.f32 1.442695, %v124_v15 }
 0x19b   :  { %189 = vpow2.f32 %v127_v16 }
 0x1a1   :  { %v188_v17 = vpop.eup %187 }
 0x1a2   :  { %129 = vadd.xlane.f32.xlu1 %v188_v17 }
 0x1a5   :  { %v190_v18 = vpop.eup %189 }
 0x1a6   :  { %131 = vadd.xlane.f32.xlu1 %v190_v18 }
 0x22f   :  { %v130_v19 = vpop.xlane.xlu1 %129 }
 0x230   :  { %191 = vlog2.f32 %v130_v19 }
 0x233   :  { %v132_v20 = vpop.xlane.xlu1 %131 }
 0x234   :  { %193 = vlog2.f32 %v132_v20 }
 0x23a   :  { %v192_v21 = vpop.eup %191 }
 0x23b   :  { %v134_v22 = vmul.f32 0.6931472, %v192_v21 }
 0x23d   :  { %v137_v23 = vsub.f32 %v123_v12, %v134_v22 }
 0x23e   :  { %v194_v24 = vpop.eup %193 }
 0x23f   :  { %139 = vst [vmem:[#allocation7] sm:$0xff] %v137_v23  ;;  %v136_v25 = vmul.f32 0.6931472, %v194_v24 }
 0x241   :  { %v138_v26 = vsub.f32 %v124_v15, %v136_v25 }
 0x243   :  { %140 = vst [vmem:[#allocation7 + $0x8] sm:$0xff] %v138_v26 }
 0x244   :  { %250 = shalt.err (!%p247_p6)
}
 0x245   :  { %s251_s15 = scalar_lea.hbm %s338_s3, 256 }
 0x246   :  { %p252_p7 = scmp.ne.s32.totalorder %s338_s3, %s251_s15  ;;  %p255_p8 = scmp.lt.u32.totalorder %s251_s15, %s338_s3 }
 0x248   :  { %p257_p9 = pnand %p255_p8, %p252_p7 }
 0x24a   :  { %260 = shalt.err (!%p257_p9)
}
 0x24b   :  { %s274_s20 = smov 128   ;;  %s275_s21 = smov 8  }
 0x24c   :  { %152 = dma.vmem_to_hbm [thread:$0]  %s147_s2, 256, %s338_s3, [#allocation4], %s274_s20, %s274_s20, %s275_s21  }
 0x24d   :  { %265 = dma.done.wait [#allocation4], 256  }
 0x24e   :  { %266 = vsyncadd [#allocation4], 4294967040 }
 0x24f   :  { %156 = vsyncpa [#allocation3], 1 }
 0x250   :  { %157 = vsyncpa [#allocation6], 1 }
 0x251   :  { %158 = vsyncpa [#allocation4], 1 }

</bundles_post_ra>
